<compile_context>
chip_gen: v6e
topology: v6e:2x2x1
jax: 0.10.0
libtpu: 0.0.40
codegen_flags: <defaults>
</compile_context>

<pallas_src>
import functools
import math

import jax
import jax.numpy as jnp
from jax.experimental import pallas as pl
from jax.experimental.pallas import tpu as pltpu


# ---------------------------------------------------------------------------
# Block-size selection (HBM-bandwidth-bound add: big legal tiles, ~2 MiB each)
# ---------------------------------------------------------------------------
_TARGET_BLOCK_BYTES = 2 * 1024 * 1024   # ~2 MiB per x/out block (v7x-safe)


def _round_up(v, m):
    return ((v + m - 1) // m) * m


def _sublane_multiple(*dtypes):
    # f32 -> 8 sublanes/vreg, bf16 -> 16, int8/fp8 -> 32; use strictest dtype.
    min_itemsize = min(jnp.dtype(dt).itemsize for dt in dtypes)
    return max(8, 32 // max(1, min_itemsize))


def _choose_2d_blocks(n_rows, n_cols, itemsize, sub_mult):
    """Blocks for a (rows, cols) elementwise add, cols on the lane axis.

    Legality: row block multiple of sub_mult or == n_rows; lane block multiple
    of 128 or == n_cols.  Targets ~_TARGET_BLOCK_BYTES per block.
    """
    budget = max(256, _TARGET_BLOCK_BYTES // itemsize)   # elements per block

    # Row block first.
    if n_rows <= sub_mult:
        tb = n_rows
    elif sub_mult * n_cols <= budget:
        tb = min(n_rows, ((budget // n_cols) // sub_mult) * sub_mult)
    else:
        tb = sub_mult

    # Lane block given the row block.
    if tb * n_cols <= budget:
        tc = n_cols
    else:
        tc = max(128, ((budget // tb) // 128) * 128)
        if tc >= n_cols:
            tc = n_cols

    # v7x has two TensorCores: make sure the grid has >= 2 steps when possible.
    if tb >= n_rows and tc >= n_cols:
        if n_rows >= 2 * sub_mult:
            half = _round_up(pl.cdiv(n_rows, 2), sub_mult)
            if half < n_rows:
                tb = half
        elif n_cols >= 256:
            half = _round_up(pl.cdiv(n_cols, 2), 128)
            if half < n_cols:
                tc = half
    return tb, tc


def _choose_seq_first_flat_blocks(a, sd, d, itemsize, sub_mult):
    """Row/lane blocks for the flattened seq-first add: (A, S*D) + tile(pos).

    Lane block must be a multiple of lcm(d, 128): multiple of 128 for layout
    legality, multiple of d so the in-kernel lane tiling of pos lines up.
    Returns None if no legal lane block exists (caller falls back to 3-D).
    """
    budget = max(256, _TARGET_BLOCK_BYTES // itemsize)
    lane_quant = (d * 128) // math.gcd(d, 128)           # lcm(d, 128)

    if a <= sub_mult:
        ta = a
    elif sub_mult * sd <= budget:
        ta = min(a, ((budget // sd) // sub_mult) * sub_mult)
    else:
        ta = sub_mult

    if ta * sd <= budget:
        tc = sd
    else:
        tc = ((budget // ta) // lane_quant) * lane_quant
        if tc < lane_quant:
            return None
        if tc >= sd:
            tc = sd

    # v7x dual-TC: guarantee >= 2 grid steps when possible.
    if ta >= a and tc >= sd:
        if a >= 2 * sub_mult:
            half = _round_up(pl.cdiv(a, 2), sub_mult)
            if half < a:
                ta = half
        elif sd >= 2 * lane_quant:
            half = _round_up(pl.cdiv(sd, 2), lane_quant)
            if half < sd:
                tc = half
    return ta, tc


def _choose_seq_first_3d_blocks(a, s, d, itemsize, sub_mult):
    """(TA, TS) for 3-D blocks (TA, TS, D): only (TS, D) is layout-constrained."""
    budget = max(256, _TARGET_BLOCK_BYTES // itemsize)
    if s <= sub_mult:
        ts = s
    elif sub_mult * d <= budget:
        ts = min(s, ((budget // d) // sub_mult) * sub_mult)
    else:
        ts = sub_mult
    # Leading dim of a 3-D block is unconstrained; NEVER rounded up (this was
    # the 8-16x VMEM inflation in the previous version).
    ta = max(1, min(a, budget // max(1, ts * d)))
    if ta >= a and ts >= s and a >= 2:
        ta = pl.cdiv(a, 2)            # >= 2 grid steps for v7x dual-TC
    return ta, ts


# ---------------------------------------------------------------------------
# Kernels
# ---------------------------------------------------------------------------
def _add_pos_rows_kernel(x_ref, pos_ref, o_ref):
    """batch-first: x (TB, TC) + pos (1, TC), broadcast over rows."""
    o_ref[...] = x_ref[...].astype(o_ref.dtype) + pos_ref[...].astype(o_ref.dtype)


def _add_pos_tiled_kernel(x_ref, pos_ref, o_ref, *, reps):
    """seq-first (flattened): x (TA, reps*D) + pos (TA, D) tiled along lanes."""
    pos = pos_ref[...].astype(o_ref.dtype)
    o_ref[...] = x_ref[...].astype(o_ref.dtype) + jnp.tile(pos, (1, reps))


def _add_pos_mid_kernel(x_ref, pos_ref, o_ref):
    """seq-first (3-D): x (TA, TS, D) + pos (TA, 1, D), broadcast over dim 1."""
    o_ref[...] = x_ref[...].astype(o_ref.dtype) + pos_ref[...].astype(o_ref.dtype)


# ---------------------------------------------------------------------------
# Wrapper (mirrors the PyTorch branch logic)
# ---------------------------------------------------------------------------
def learned_positional_encoding(x, pos_embedding):
    """x: (A, S, D) array.  pos_embedding: (1, max_len, d_model) parameter."""
    if x.ndim != 3:
        # PyTorch module only logs a warning and applies (eval-mode) dropout.
        return x

    max_len = pos_embedding.shape[1]
    d_model = pos_embedding.shape[2]
    a, s, d = x.shape

    # Branch selection, exactly as in the PyTorch forward.
    if a == max_len and d == d_model:
        mode = "seq_first"           # branch 1
    elif s == max_len and d == d_model:
        mode = "batch_first"         # branch 2
    elif s <= max_len:
        mode = "batch_first"         # branch 3
    elif a <= max_len:
        mode = "seq_first"           # branch 4
    else:
        # PyTorch's warning path: no positional add is applied.
        return x

    if d != d_model:
        raise ValueError(
            f"d_model mismatch: x feature dim {d} vs pos_embedding {d_model}")

    out_dtype = jnp.result_type(x.dtype, pos_embedding.dtype)
    itemsize = max(jnp.dtype(x.dtype).itemsize,
                   jnp.dtype(pos_embedding.dtype).itemsize,
                   jnp.dtype(out_dtype).itemsize)
    sub_mult = _sublane_multiple(x.dtype, pos_embedding.dtype, out_dtype)

    pos_rows = s if mode == "batch_first" else a
    cost = pl.CostEstimate(
        flops=a * s * d,
        transcendentals=0,
        bytes_accessed=(x.size * jnp.dtype(x.dtype).itemsize
                        + a * s * d * jnp.dtype(out_dtype).itemsize
                        + pos_rows * d * jnp.dtype(pos_embedding.dtype).itemsize),
    )
    compiler_params = pltpu.CompilerParams(
        dimension_semantics=("parallel", "parallel"))
    sd = s * d

    if mode == "batch_first":
        # Flatten to 2-D so the store lane-width is up to S*D (lane-dense),
        # and block many batch rows per grid step.
        x2 = x.reshape(a, sd)
        pos2 = pos_embedding[0, :s, :].reshape(1, sd)
        tb, tc = _choose_2d_blocks(a, sd, itemsize, sub_mult)
        # Lane-chunk axis outermost: the pos block depends only on the lane
        # chunk, so it stays resident across the inner row loop.
        grid = (pl.cdiv(sd, tc), pl.cdiv(a, tb))

        out2 = pl.pallas_call(
            _add_pos_rows_kernel,
            out_shape=jax.ShapeDtypeStruct((a, sd), out_dtype),
            grid_spec=pltpu.PrefetchScalarGridSpec(
                num_scalar_prefetch=0,
                grid=grid,
                in_specs=[
                    pl.BlockSpec((tb, tc), lambda j, i: (i, j)),
                    pl.BlockSpec((1, tc), lambda j, i: (0, j)),
                ],
                out_specs=pl.BlockSpec((tb, tc), lambda j, i: (i, j)),
            ),
            compiler_params=compiler_params,
            cost_estimate=cost,
        )(x2, pos2)
        return out2.reshape(a, s, d)

    # ---- seq_first: out[a, s, :] = x[a, s, :] + pos[a, :] ----
    flat = None
    if d % 128 != 0:
        flat = _choose_seq_first_flat_blocks(a, sd, d, itemsize, sub_mult)

    if flat is not None:
        # Lane-dense path: flatten x to (A, S*D); tile pos rows along lanes
        # inside the kernel (cheap VMEM work vs. masked HBM stores).
        ta, tc = flat
        reps = tc // d
        x2 = x.reshape(a, sd)
        pos = pos_embedding[0, :a, :]                       # (A, D)
        # Row axis outermost: the pos block depends only on the row chunk,
        # so it stays resident across the inner lane loop.
        grid = (pl.cdiv(a, ta), pl.cdiv(sd, tc))

        out2 = pl.pallas_call(
            functools.partial(_add_pos_tiled_kernel, reps=reps),
            out_shape=jax.ShapeDtypeStruct((a, sd), out_dtype),
            grid_spec=pltpu.PrefetchScalarGridSpec(
                num_scalar_prefetch=0,
                grid=grid,
                in_specs=[
                    pl.BlockSpec((ta, tc), lambda i, j: (i, j)),
                    pl.BlockSpec((ta, d), lambda i, j: (i, 0)),
                ],
                out_specs=pl.BlockSpec((ta, tc), lambda i, j: (i, j)),
            ),
            compiler_params=compiler_params,
            cost_estimate=cost,
        )(x2, pos)
        return out2.reshape(a, s, d)

    # 3-D path: D is a multiple of 128 (already lane-dense) or no legal lane
    # blocking of the flattened layout exists.  pos is carried as (A, 1, D) so
    # its block's last two dims are (1, D) -- legal for any leading block size.
    ta, ts = _choose_seq_first_3d_blocks(a, s, d, itemsize, sub_mult)
    pos3 = pos_embedding[0, :a, :].reshape(a, 1, d)
    grid = (pl.cdiv(a, ta), pl.cdiv(s, ts))

    out = pl.pallas_call(
        _add_pos_mid_kernel,
        out_shape=jax.ShapeDtypeStruct((a, s, d), out_dtype),
        grid_spec=pltpu.PrefetchScalarGridSpec(
            num_scalar_prefetch=0,
            grid=grid,
            in_specs=[
                pl.BlockSpec((ta, ts, d), lambda i, j: (i, j, 0)),
                pl.BlockSpec((ta, 1, d), lambda i, j: (i, 0, 0)),
            ],
            out_specs=pl.BlockSpec((ta, ts, d), lambda i, j: (i, j, 0)),
        ),
        compiler_params=compiler_params,
        cost_estimate=cost,
    )(x, pos3)
    # nn.Dropout(p=0.1) in eval mode is the identity.
    return out


# ---------------------------------------------------------------------------
# Demo / self-test
# ---------------------------------------------------------------------------
if __name__ == "__main__":
    key = jax.random.PRNGKey(0)
    k_pos, k_x1, k_x2 = jax.random.split(key, 3)

    d_model = 32
    max_len = 64
    batch = 2
    seq = 8

    pos_embedding = jax.random.normal(k_pos, (1, max_len, d_model), jnp.float32)

    # Batch-first branch (branch 3): x (B, S, D), S <= max_len.
    x = jax.random.normal(k_x1, (batch, seq, d_model), jnp.float32)
    out = jax.block_until_ready(learned_positional_encoding(x, pos_embedding))
    ref = x + pos_embedding[:, :seq, :]
    assert out.shape == x.shape and out.dtype == ref.dtype
    assert jnp.allclose(out, ref, atol=1e-6), "mismatch vs reference (batch-first)"

    # Seq-first branch (branch 1): x (max_len, B, D).
    x2 = jax.random.normal(k_x2, (max_len, 3, d_model), jnp.float32)
    out2 = jax.block_until_ready(learned_positional_encoding(x2, pos_embedding))
    ref2 = x2 + pos_embedding[0, :max_len, :][:, None, :]
    assert out2.shape == x2.shape
    assert jnp.allclose(out2, ref2, atol=1e-6), "mismatch vs reference (seq-first)"

    print("KERNEL_OK")
</pallas_src>

<mosaic_0001>
module attributes {stable_mosaic.version = 11 : i64} {
  func.func @_add_pos_rows_kernel(%arg0: i32, %arg1: i32, %arg2: memref<2x128xf32, #tpu.memory_space<vmem>>, %arg3: memref<1x128xf32, #tpu.memory_space<vmem>>, %arg4: memref<2x128xf32, #tpu.memory_space<vmem>>) attributes {dimension_semantics = [#tpu.dimension_semantics<parallel>, #tpu.dimension_semantics<parallel>], iteration_bounds = array<i64: 2, 1>, scalar_prefetch = 0 : i64, scratch_operands = 0 : i64, tpu.core_type = #tpu.core_type<tc>, window_params = [{transform_indices = @transform_0, window_bounds = array<i64: 2, 128>}, {transform_indices = @transform_1, window_bounds = array<i64: 1, 128>}, {transform_indices = @transform_2, window_bounds = array<i64: 2, 128>}]} {
    %c0 = arith.constant 0 : index
    %c0_0 = arith.constant 0 : index
    %0 = vector.load %arg2[%c0, %c0_0] : memref<2x128xf32, #tpu.memory_space<vmem>>, vector<2x128xf32>
    %c0_1 = arith.constant 0 : index
    %c0_2 = arith.constant 0 : index
    %1 = vector.load %arg3[%c0_1, %c0_2] : memref<1x128xf32, #tpu.memory_space<vmem>>, vector<1x128xf32>
    %2 = vector.broadcast %1 : vector<1x128xf32> to vector<2x128xf32>
    %3 = arith.addf %0, %2 : vector<2x128xf32>
    %c0_3 = arith.constant 0 : index
    %c0_4 = arith.constant 0 : index
    %4 = vector.load %arg4[%c0_3, %c0_4] : memref<2x128xf32, #tpu.memory_space<vmem>>, vector<2x128xf32>
    tpu.vector_store %arg4[%c0_3, %c0_4], %3 {strides = array<i32>} : memref<2x128xf32, #tpu.memory_space<vmem>>, vector<2x128xf32>,
    return
  }
  func.func @transform_0(%arg0: i32, %arg1: i32) -> (i32, i32) {
    %c0_i32 = arith.constant 0 : i32
    return %arg1, %arg0 : i32, i32
  }
  func.func @transform_1(%arg0: i32, %arg1: i32) -> (i32, i32) {
    %c0_i32 = arith.constant 0 : i32
    %c0_i32_0 = arith.constant 0 : i32
    return %c0_i32, %arg0 : i32, i32
  }
  func.func @transform_2(%arg0: i32, %arg1: i32) -> (i32, i32) {
    %c0_i32 = arith.constant 0 : i32
    return %arg1, %arg0 : i32, i32
  }
}

</mosaic_0001>

<bundles_post_ra>
// kernel: tpu_custom_call.1
= control target key start
LH: loop header
LB: loop body
LE: loop exit
PB: predicated region body
PF: predicated region fallthrough
CT: control target
= control target key end

     0   :  { %7 = vsyncpa [#allocation3], 0  ;;  %s745_s0 = inlined_call_operand.hbm [shape: f32[2,256], index: 0, kind: input, shape index: {}]   ;;  %s746_s1 = inlined_call_operand.hbm [shape: f32[1,256], index: 1, kind: input, shape index: {}]   ;;  %s747_s2 = inlined_call_operand.hbm [shape: f32[2,256], index: 2, kind: output, shape index: {}]  }
   0x1   :  { %9 = vsyncpa [#allocation3 + $0x1], 0 }
   0x2   :  { %10 = vsyncpa [#allocation6], 0 }
   0x3   :  { %12 = vsyncpa [#allocation6 + $0x1], 0 }
   0x4   :  { %13 = vsyncpa [#allocation4], 0 }
   0x5   :  { %15 = vsyncpa [#allocation4 + $0x1], 0  ;;  %s581_s9 = smov 0   ;;  %s583_s10 = smov 0  }
   0x6   :  { %s585_s11 = smov 0   ;;  %s587_s12 = smov 0  }
   0x7   :  { %s589_s13 = smov 0   ;;  %s591_s14 = smov 0  }
   0x8 LB: > { %s339_s15 = sadd.s32 4294967295, %s561_s14   ;;  %s340_s16 = sadd.s32 4294967294, %s561_s14   ;;  %s561_s14 = sphi %s591_s14, %s21_s14   ;;  %s557_s13 = sphi %s589_s13, %s759_s13   ;;  %s553_s12 = sphi %s587_s12, %s758_s12   ;;  %s549_s11 = sphi %s585_s11, %s757_s11   ;;  %s545_s10 = sphi %s583_s10, %s756_s10   ;;  %s541_s9 = sphi %s581_s9, %s755_s9  }
   0x9   : > { %s33_s17 = sadd.s32 1, %s557_s13  ;;  %s42_s18 = sadd.s32 1, %s549_s11 }
   0xa   : > { %p35_p0 = scmp.ge.s32.totalorder %s33_s17, 2  ;;  %p49_p1 = scmp.ne.s32.totalorder %s549_s11, %s545_s10 }
   0xb   : > { %p50_p2 = scmp.eq.s32.totalorder %s561_s14, 0  ;;  %p55_p3 = scmp.ne.s32.totalorder %s545_s10, %s541_s9 }
   0xc   : > { %s761_s17 = smov (%p35_p0, %s33_s17), 0  ;;  %p56_p5 = scmp.eq.s32.totalorder %s339_s15, 0 }
   0xd   : > { %p622_p4 = por %p50_p2, %p49_p1  ;;  %s38_s20 = ssub.s32 %s557_s13, %s761_s17 }
   0xe   : > { %p107_p6 = scmp.eq.s32.totalorder %s339_s15, 1  ;;  %p40_p7 = scmp.eq.s32.totalorder %s38_s20, 0 }
   0xf   : > { %p628_p8 = por %p56_p5, %p55_p3  ;;  %p113_p10 = scmp.eq.s32.totalorder %s340_s16, 1 }
  0x10   : > { %p632_p9 = por %p107_p6, %p49_p1  ;;  %p371_p13 = scmp.lt.s32.totalorder %s561_s14, 2 }
  0x11   : > { %s637_s23 = scalar_select %p40_p7, %s549_s11, %s42_s18  }
  0x12   : > { %p639_p11 = por %p113_p10, %p55_p3  ;;  %s646_s25 = sand.u32 1, %s549_s11  }
  0x13   : > { %s343_s26 = sshll.u32 %s646_s25, 1  ;;  %s344_s27 = sshll.u32 %s557_s13, 5 }
  0x14   : > { %s144_s30 = scalar_lea.hbm %s745_s0, %s344_s27  ;;  %s137_s3 = scalar_lea.vmem [#allocation2], %s343_s26 }
  0x15   : > { %s146_s4 = sshll.u32 %s137_s3, 4  ;;  %p655_p0 = pnand %p371_p13, %p622_p4  ;;  %s147_s4 = int_to_ptr.vmem [resolvable:$true] %s146_s4 }
  0x16   : > { %p346_p1 = scmp.ge.s32.totalorder %s561_s14, 1  ;;  %p168_p2 = scmp.lt.s32.totalorder %s561_s14, 3 }
  0x17   : > { %s134_s6 = scalar_lea.sflag [#allocation3], %s646_s25  ;;  %p423_p3 = pneg %p655_p0 }
  0x18   : > { %s434_s7 = scalar_lea.vmem %s147_s4, 32  ;;  %s563_s8 = smov [#allocation2]  }
  0x19   : > { %p435_p5 = scmp.ne.s32.totalorder %s147_s4, %s434_s7  ;;  %s439_s15 = sshll.u32 %s563_s8, 4  ;;  %s440_s15 = int_to_ptr.vmem [resolvable:$false] %s439_s15 }
  0x1a   : > { %s441_s16 = scalar_lea.vmem %s440_s15, 64  ;;  %p442_p4 = scmp.lt.s32.totalorder %s147_s4, %s440_s15 }
  0x1b   : > { %p437_p6 = pnand %p435_p5, %p423_p3  ;;  %p443_p10 = scmp.lt.s32.totalorder %s441_s16, %s434_s7 }
  0x1d   : > { %p438_p7 = pneg %p437_p6  ;;  %p444_p13 = por %p443_p10, %p442_p4 }
  0x1f   : > { %p445_p12 = pnand %p444_p13, %p438_p7 }
  0x21   : > { %448 = shalt.err (!%p445_p12)
}
  0x22   : > { %363 = dma.hbm_to_vmem [thread:$0]  (!%p655_p0), %s144_s30, 32, %s147_s4, %s134_s6  }
  0x23   : > { %p673_p5 = pnand %p346_p1, %p168_p2  ;;  %s345_s19 = sshll.u32 %s557_s13, 4 }
  0x24   : > { %s156_s20 = scalar_lea.vmem [#allocation5], %s646_s25  ;;  %s161_s29 = scalar_lea.hbm %s746_s1, %s345_s19 }
  0x25   : > { %s163_s26 = sshll.u32 %s156_s20, 4  ;;  %s154_s3 = scalar_lea.sflag [#allocation6], %s646_s25  ;;  %s164_s26 = int_to_ptr.vmem [resolvable:$true] %s163_s26 }
  0x26   : > { %s462_s7 = scalar_lea.vmem %s164_s26, 16  ;;  %s564_s30 = smov [#allocation5]  }
  0x27   : > { %p463_p12 = scmp.ne.s32.totalorder %s164_s26, %s462_s7  ;;  %s467_s4 = sshll.u32 %s564_s30, 4  ;;  %s468_s4 = int_to_ptr.vmem [resolvable:$false] %s467_s4 }
  0x28   : > { %s469_s6 = scalar_lea.vmem %s468_s4, 32  ;;  %p470_p1 = scmp.lt.s32.totalorder %s164_s26, %s468_s4 }
  0x29   : > { %p465_p6 = pnand %p463_p12, %p423_p3  ;;  %p471_p2 = scmp.lt.s32.totalorder %s469_s6, %s462_s7 }
  0x2b   : > { %p466_p7 = pneg %p465_p6  ;;  %p472_p4 = por %p471_p2, %p470_p1 }
  0x2d   : > { %p473_p10 = pnand %p472_p4, %p466_p7 }
  0x2f   : > { %476 = shalt.err (!%p473_p10)
}
  0x30   : > { %366 = dma.hbm_to_vmem [thread:$0]  (!%p655_p0), %s161_s29, 16, %s164_s26, %s154_s3  }
  0x31   : > { %172 = sbr.rel (%p673_p5) target bundleno = 81 (0x51), region = 28  ;;  %s691_s25 = sand.u32 (!%p673_p5), 1, %s545_s10  }
  0x32   : > { %s347_s8 = sshll.u32 (!%p673_p5), %s691_s25, 1  ;;  %s175_s15 = scalar_lea.sflag (!%p673_p5), [#allocation3], %s691_s25 }
  0x33   : > { %s178_s16 = scalar_lea.vmem (!%p673_p5), [#allocation2], %s347_s8 }
  0x36   : > { %528 = dma.done.wait (%p628_p8), %s175_s15, 32  }
  0x37   : > { %530 = vsyncadd (%p628_p8), %s175_s15, 4294967264  ;;  %s184_s5 = scalar_lea.sflag [#allocation6], %s691_s25  ;;  %s186_s18 = scalar_lea.vmem [#allocation5], %s691_s25 }
  0x38   : > { %532 = dma.done.wait (%p628_p8), %s184_s5, 16  }
  0x39   : > { %534 = vsyncadd (%p628_p8), %s184_s5, 4294967280  ;;  %s210_s19 = scalar_lea.vmem [#allocation7], %s347_s8  ;;  %s351_s26 = sshll.u32 %s553_s12, 5  ;;  %v211_v0 = vld [vmem:[%s178_s16] sm:$0x3] }
  0x3a   : > { %s237_s20 = sshll.u32 %s210_s19, 4  ;;  %v349_v1 = vld [vmem:[%s186_s18] ss:$0 sm:$0xff]  ;;  %s235_s29 = scalar_lea.hbm %s747_s2, %s351_s26  ;;  %s238_s20 = int_to_ptr.vmem [resolvable:$true] %s237_s20 }
  0x3b   : > { %v219_v2 = vadd.f32 %v349_v1, %v211_v0  ;;  %s222_s3 = scalar_lea.sflag [#allocation4], %s691_s25  ;;  %s477_s7 = scalar_lea.vmem %s238_s20, 32 }
  0x3c   : > { %p478_p0 = scmp.ne.s32.totalorder %s238_s20, %s477_s7  ;;  %s565_s21 = smov [#allocation7]  }
  0x3d   : > { %220 = vst [vmem:[%s210_s19] sm:$0x3] %v219_v2  ;;  %s481_s30 = sshll.u32 %s565_s21, 4  ;;  %s482_s30 = int_to_ptr.vmem [resolvable:$false] %s481_s30 }
  0x3e   : > { %p479_p8 = pnand %p478_p0, %p632_p9  ;;  %s483_s4 = scalar_lea.vmem %s482_s30, 64 }
  0x3f   : > { %p484_p13 = scmp.lt.s32.totalorder %s238_s20, %s482_s30  ;;  %p485_p5 = scmp.lt.s32.totalorder %s483_s4, %s477_s7 }
  0x40   : > { %p480_p3 = pneg %p479_p8 }
  0x41   : > { %p486_p12 = por %p485_p5, %p484_p13 }
  0x43   : > { %p487_p6 = pnand %p486_p12, %p480_p3 }
  0x45   : > { %490 = shalt.err (!%p487_p6)
}
  0x46   : > { %s491_s12 = scalar_lea.hbm %s235_s29, 32  ;;  %s495_s8 = scalar_lea.hbm %s747_s2, 64 }
  0x47   : > { %p492_p7 = scmp.ne.s32.totalorder %s235_s29, %s491_s12  ;;  %p496_p4 = scmp.lt.s32.totalorder %s235_s29, %s747_s2 }
  0x48   : > { %p497_p10 = scmp.lt.s32.totalorder %s495_s8, %s491_s12 }
  0x49   : > { %p493_p1 = pnand %p492_p7, %p632_p9 }
  0x4a   : > { %p498_p0 = por %p497_p10, %p496_p4 }
  0x4b   : > { %p494_p2 = pneg %p493_p1 }
  0x4d   : > { %p499_p8 = pnand %p498_p0, %p494_p2 }
  0x4f   : > { %502 = shalt.err (!%p499_p8)
}
  0x50   : > { %358 = dma.vmem_to_hbm [thread:$0]  (%p632_p9), %s238_s20, 32, %s235_s29, %s222_s3  }
  0x51 PF: > { %s249_s5 = sand.u32 1, %s541_s9   ;;  %p754_p3 = scmp.ge.s32.totalorder %s561_s14, 2 }
  0x52   : > { %s250_s18 = scalar_lea.sflag [#allocation4], %s249_s5 }
  0x53   : > { %p368_p13 = pnand %p754_p3, %p639_p11 }
  0x55   : > { %p369_p5 = pneg %p368_p13 }
  0x57   : > { %536 = dma.done.wait (%p369_p5), %s250_s18, 32  }
  0x58   : > { %538 = vsyncadd (%p369_p5), %s250_s18, 4294967264  ;;  %s21_s14 = sadd.s32 1, %s561_s14   ;;  %s755_s9 = smov %s545_s10 }
  0x59   : > { %p18_p12 = scmp.ge.s32.totalorder %s21_s14, 4   ;;  %s756_s10 = smov %s549_s11 }
  0x5a   : > { %s757_s11 = smov %s637_s23  ;;  %s758_s12 = smov %s557_s13 }
  0x5b   : > { %s759_s13 = smov %s761_s17  ;;  %20 = sbr.rel (!%p18_p12) target bundleno = 8 (0x8), region = 86 }
  0x60   :  { %255 = vsyncpa [#allocation3], 1 }
  0x61   :  { %257 = vsyncpa [#allocation3 + $0x1], 1 }
  0x62   :  { %258 = vsyncpa [#allocation6], 1 }
  0x63   :  { %260 = vsyncpa [#allocation6 + $0x1], 1 }
  0x64   :  { %261 = vsyncpa [#allocation4], 1 }
  0x65   :  { %263 = vsyncpa [#allocation4 + $0x1], 1 }

</bundles_post_ra>
